<compile_context>
chip_gen: v7x
topology: tpu7x:2x2x1
jax: 0.10.0
libtpu: 0.0.40
codegen_flags: <defaults>
</compile_context>

<pallas_src>
import functools

import jax
import jax.numpy as jnp
from jax.experimental import pallas as pl
from jax.experimental.pallas import tpu as pltpu


def _round_up(n, m):
    return ((n + m - 1) // m) * m


@functools.lru_cache(maxsize=None)
def _vmem_budget_bytes():
    """Per-core VMEM capacity minus headroom (v5e/v6e: 128 MiB, v7x: 64 MiB)."""
    try:
        cap = int(pltpu.get_tpu_info().vmem_capacity_bytes)
    except Exception:
        cap = 64 << 20  # conservative (v7x-sized) fallback
    return max(32 << 20, int(cap * 0.8))


# ---------------------------------------------------------------------------
# Kernel body
# ---------------------------------------------------------------------------
def _dpp_kernel(x_ref, wf_ref, bf_ref, wgu_ref, bgu_ref, out_ref, *,
                f_out, f_out_p):
    # Cast AFTER the DMA: x stays in its storage dtype in HBM/VMEM.
    x = x_ref[...].astype(wf_ref.dtype)                      # [bb, F_in]

    # ONE wide MXU matmul produces z_a | z_b | x_g (128-aligned column groups).
    fused = jnp.dot(x, wf_ref[...], preferred_element_type=jnp.float32)
    fused = fused + bf_ref[...]                              # f32 [bb, 2*F_out_p+G_p]

    z_a = fused[:, :f_out_p]
    z_b = fused[:, f_out_p:2 * f_out_p]
    x_g = fused[:, 2 * f_out_p:]                             # [bb, G_p]

    # Small dependent gating matmul; accumulation stays f32.
    g_logits = jnp.dot(x_g.astype(wgu_ref.dtype), wgu_ref[...],
                       preferred_element_type=jnp.float32) + bgu_ref[...]
    alpha = jax.nn.sigmoid(g_logits)                         # EUP slot

    # z_b + alpha*(z_a - z_b) == alpha*z_a + (1-alpha)*z_b, 3 VALU ops not 5.
    out = z_b + alpha * (z_a - z_b)
    out_ref[...] = out[:, :f_out].astype(out_ref.dtype)


# ---------------------------------------------------------------------------
# One-time parameter preparation (NOT in the per-call hot path)
# ---------------------------------------------------------------------------
def prepare_params(w_a, b_a, w_b, b_b, w_g_shared, b_g_shared,
                   w_g_unit, b_g_unit, *, compute_dtype=jnp.float32):
    """Transpose PyTorch-convention [out, in] weights to [in, out], zero-pad
    ONLY the output (lane) dims to multiples of 128, fuse w_a|w_b|w_g_shared
    (and their biases) along the lane dim, and cast the matmul operands to
    `compute_dtype`. Zero padding is mathematically inert; K dims are left
    unpadded so x needs no per-call padding. Call once."""
    F_out, F_in = w_a.shape
    G = w_g_shared.shape[0]
    F_out_p = _round_up(F_out, 128)
    G_p = _round_up(G, 128)

    def prep_w(w, cols_p):                                   # [out, in] -> [in, out_p]
        wt = w.T.astype(jnp.float32)
        return jnp.pad(wt, ((0, 0), (0, cols_p - wt.shape[1])))

    def prep_b(b, n_p):                                      # [n] -> [n_p], kept f32
        return jnp.pad(b.astype(jnp.float32), (0, n_p - b.shape[0]))

    w_fused = jnp.concatenate(
        [prep_w(w_a, F_out_p), prep_w(w_b, F_out_p), prep_w(w_g_shared, G_p)],
        axis=1).astype(compute_dtype)                        # [F_in, 2*F_out_p+G_p]
    b_fused = jnp.concatenate(
        [prep_b(b_a, F_out_p), prep_b(b_b, F_out_p), prep_b(b_g_shared, G_p)]
    ).reshape(1, -1)                                         # f32 [1, 2*F_out_p+G_p]

    wgu = jnp.pad(w_g_unit.T.astype(jnp.float32),
                  ((0, G_p - G), (0, F_out_p - F_out))).astype(compute_dtype)
    bgu = prep_b(b_g_unit, F_out_p).reshape(1, -1)           # f32 [1, F_out_p]

    params = {"w_fused": w_fused, "b_fused": b_fused, "wgu": wgu, "bgu": bgu}
    dims = (int(F_in), int(F_out), int(G), int(F_out_p), int(G_p))
    return params, dims


# ---------------------------------------------------------------------------
# Jitted forward
# ---------------------------------------------------------------------------
@functools.partial(jax.jit, static_argnames=("dims", "block_b"))
def _dpp_forward(x, params, dims, block_b):
    F_in, F_out, G, F_out_p, G_p = dims
    B = x.shape[0]
    NF = 2 * F_out_p + G_p
    grid = (pl.cdiv(B, block_b),)

    w_item = jnp.dtype(params["w_fused"].dtype).itemsize
    x_item = jnp.dtype(x.dtype).itemsize

    # Weights/biases are single-buffered (counted once); x/out double-buffered.
    weight_bytes = (F_in * NF + G_p * F_out_p) * w_item
    bias_bytes = (NF + F_out_p) * 4
    tile_bytes = 2 * block_b * (F_in * x_item + F_out * x_item)
    vmem_need = weight_bytes + bias_bytes + tile_bytes
    vmem_limit = int(min(max(int(vmem_need * 1.5), 32 << 20), _vmem_budget_bytes()))
    # TODO(synk): when weight_bytes exceeds ~1/3 of the VMEM budget (very large
    # F_in/F_out at f32), add an F_out grid axis (tile w_a/w_b/w_g_unit over N
    # and keep x_g in a VMEM scratch computed under pl.when(n == 0)) so the
    # layer still fits v7x's 64 MiB/TC VMEM.

    flops = 2 * B * F_in * NF + 2 * B * G_p * F_out_p + 3 * B * F_out_p
    bytes_accessed = (weight_bytes + bias_bytes
                      + B * F_in * x_item + B * F_out * x_item)
    cost = pl.CostEstimate(flops=flops, transcendentals=B * F_out_p,
                           bytes_accessed=bytes_accessed)

    kernel = functools.partial(_dpp_kernel, f_out=F_out, f_out_p=F_out_p)
    const = dict(pipeline_mode=pl.Buffered(1))   # grid-invariant operands

    return pl.pallas_call(
        kernel,
        out_shape=jax.ShapeDtypeStruct((B, F_out), x.dtype),
        grid_spec=pltpu.PrefetchScalarGridSpec(
            num_scalar_prefetch=0,
            grid=grid,
            in_specs=[
                pl.BlockSpec((block_b, F_in), lambda i: (i, 0)),          # x tile
                pl.BlockSpec((F_in, NF), lambda i: (0, 0), **const),      # w_a|w_b|w_gs
                pl.BlockSpec((1, NF), lambda i: (0, 0), **const),         # b_a|b_b|b_gs
                pl.BlockSpec((G_p, F_out_p), lambda i: (0, 0), **const),  # w_g_unit^T
                pl.BlockSpec((1, F_out_p), lambda i: (0, 0), **const),    # b_g_unit
            ],
            out_specs=pl.BlockSpec((block_b, F_out), lambda i: (i, 0)),
        ),
        compiler_params=pltpu.CompilerParams(
            dimension_semantics=("parallel",),
            vmem_limit_bytes=vmem_limit),
        cost_estimate=cost,
    )(x, params["w_fused"], params["b_fused"], params["wgu"], params["bgu"])


def dpp_layer_shared_g(x, params, dims, *, block_b=None):
    """x: [B, F_in]; params/dims from prepare_params()."""
    B = x.shape[0]
    sublane = 16 if params["w_fused"].dtype == jnp.bfloat16 else 8
    if block_b is None:
        if B >= 512:
            block_b = 256                # MXU-height multiple, amortizes step overhead
        else:
            # Aim for >= 2 grid steps (v7x has 2 TensorCores), sublane aligned.
            block_b = max(sublane, _round_up(-(-B // 2), sublane))
    block_b = max(sublane, _round_up(block_b, sublane))
    block_b = min(block_b, _round_up(B, sublane))
    return _dpp_forward(x, params, dims, block_b)


# ---------------------------------------------------------------------------
# Deterministic init (mimics kaiming_uniform_(a=sqrt(5)) + uniform bias) + ref
# ---------------------------------------------------------------------------
def _init_params(key, input_features, output_features, shared_g_dim):
    def kaiming_uniform(k, shape):
        fan_in = shape[1]
        gain = (1.0 / 3.0) ** 0.5
        bound = gain * (3.0 ** 0.5) / (fan_in ** 0.5)
        return jax.random.uniform(k, shape, jnp.float32, -bound, bound)

    def bias_uniform(k, fan_in, n):
        bound = 1.0 / (fan_in ** 0.5)
        return jax.random.uniform(k, (n,), jnp.float32, -bound, bound)

    ks = jax.random.split(key, 8)
    w_a = kaiming_uniform(ks[0], (output_features, input_features))
    b_a = bias_uniform(ks[1], input_features, output_features)
    w_b = kaiming_uniform(ks[2], (output_features, input_features))
    b_b = bias_uniform(ks[3], input_features, output_features)
    w_g_shared = kaiming_uniform(ks[4], (shared_g_dim, input_features))
    b_g_shared = bias_uniform(ks[5], input_features, shared_g_dim)
    w_g_unit = kaiming_uniform(ks[6], (output_features, shared_g_dim))
    b_g_unit = bias_uniform(ks[7], shared_g_dim, output_features)
    return w_a, b_a, w_b, b_b, w_g_shared, b_g_shared, w_g_unit, b_g_unit


def _reference(x, w_a, b_a, w_b, b_b, w_g_shared, b_g_shared, w_g_unit, b_g_unit):
    z_a = x @ w_a.T + b_a
    z_b = x @ w_b.T + b_b
    x_g = x @ w_g_shared.T + b_g_shared
    g_logits = x_g @ w_g_unit.T + b_g_unit
    alpha = jax.nn.sigmoid(g_logits)
    return alpha * z_a + (1.0 - alpha) * z_b


if __name__ == "__main__":
    input_features = 32
    output_features = 32
    shared_g_dim = 16
    batch = 16

    key = jax.random.PRNGKey(0)
    k_x, k_p = jax.random.split(key)
    x = jax.random.normal(k_x, (batch, input_features), jnp.float32)
    raw_params = _init_params(k_p, input_features, output_features, shared_g_dim)
    ref = _reference(x, *raw_params)

    # f32 compute path; block_b=8 -> 2-step batch grid (exercises pipelining).
    params_f32, dims = prepare_params(*raw_params, compute_dtype=jnp.float32)
    out = jax.block_until_ready(dpp_layer_shared_g(x, params_f32, dims, block_b=8))
    assert out.shape == (batch, output_features)
    assert jnp.allclose(out, ref, atol=1e-5, rtol=1e-5), "f32 mismatch vs reference"

    # Ragged batch -> partial final block, exercises masked OOB output stores.
    x_r = x[:10]
    out_r = jax.block_until_ready(dpp_layer_shared_g(x_r, params_f32, dims, block_b=8))
    assert out_r.shape == (10, output_features)
    assert jnp.allclose(out_r, ref[:10], atol=1e-5, rtol=1e-5), "ragged mismatch"

    # bf16 MXU path (f32 accumulation) — looser tolerance vs f32 reference.
    params_bf16, dims_b = prepare_params(*raw_params, compute_dtype=jnp.bfloat16)
    out_b = jax.block_until_ready(dpp_layer_shared_g(x, params_bf16, dims_b))
    assert out_b.shape == (batch, output_features)
    assert jnp.allclose(out_b, ref, atol=5e-2, rtol=5e-2), "bf16 mismatch vs reference"

    print("KERNEL_OK")
</pallas_src>

<mosaic_0001>
module attributes {stable_mosaic.version = 11 : i64} {
  func.func @_dpp_kernel(%arg0: i32, %arg1: memref<8x32xf32, #tpu.memory_space<vmem>>, %arg2: memref<32x384xf32, #tpu.memory_space<vmem>>, %arg3: memref<1x384xf32, #tpu.memory_space<vmem>>, %arg4: memref<128x128xf32, #tpu.memory_space<vmem>>, %arg5: memref<1x128xf32, #tpu.memory_space<vmem>>, %arg6: memref<8x32xf32, #tpu.memory_space<vmem>>) attributes {dimension_semantics = [#tpu.dimension_semantics<parallel>], iteration_bounds = array<i64: 2>, scalar_prefetch = 0 : i64, scratch_operands = 0 : i64, tpu.core_type = #tpu.core_type<tc>, window_params = [{transform_indices = @transform_0, window_bounds = array<i64: 8, 32>}, {pipeline_mode = #tpu.pipeline_mode<synchronous>, transform_indices = @transform_1, window_bounds = array<i64: 32, 384>}, {pipeline_mode = #tpu.pipeline_mode<synchronous>, transform_indices = @transform_2, window_bounds = array<i64: 1, 384>}, {pipeline_mode = #tpu.pipeline_mode<synchronous>, transform_indices = @transform_3, window_bounds = array<i64: 128, 128>}, {pipeline_mode = #tpu.pipeline_mode<synchronous>, transform_indices = @transform_4, window_bounds = array<i64: 1, 128>}, {transform_indices = @transform_5, window_bounds = array<i64: 8, 32>}]} {
    %c0 = arith.constant 0 : index
    %c0_0 = arith.constant 0 : index
    %0 = vector.load %arg1[%c0, %c0_0] : memref<8x32xf32, #tpu.memory_space<vmem>>, vector<8x32xf32>
    %c0_1 = arith.constant 0 : index
    %c0_2 = arith.constant 0 : index
    %1 = vector.load %arg2[%c0_1, %c0_2] : memref<32x384xf32, #tpu.memory_space<vmem>>, vector<32x384xf32>
    %cst = arith.constant dense<0.000000e+00> : vector<8x384xf32>
    %2 = tpu.matmul %0, %1, %cst {dimension_numbers = #tpu.dot_dimension_numbers<[1], [0], [0], [1], [0, 0, 1, 1], [], []>} : vector<8x32xf32>, vector<32x384xf32>, vector<8x384xf32> -> vector<8x384xf32>
    %c0_3 = arith.constant 0 : index
    %c0_4 = arith.constant 0 : index
    %3 = vector.load %arg3[%c0_3, %c0_4] : memref<1x384xf32, #tpu.memory_space<vmem>>, vector<1x384xf32>
    %4 = vector.broadcast %3 : vector<1x384xf32> to vector<8x384xf32>
    %5 = arith.addf %2, %4 : vector<8x384xf32>
    %6 = vector.extract_strided_slice %5 {offsets = [0, 0], sizes = [8, 128], strides = [1, 1]} : vector<8x384xf32> to vector<8x128xf32>
    %7 = vector.extract_strided_slice %5 {offsets = [0, 128], sizes = [8, 128], strides = [1, 1]} : vector<8x384xf32> to vector<8x128xf32>
    %8 = vector.extract_strided_slice %5 {offsets = [0, 256], sizes = [8, 128], strides = [1, 1]} : vector<8x384xf32> to vector<8x128xf32>
    %c0_5 = arith.constant 0 : index
    %c0_6 = arith.constant 0 : index
    %9 = vector.load %arg4[%c0_5, %c0_6] : memref<128x128xf32, #tpu.memory_space<vmem>>, vector<128x128xf32>
    %cst_7 = arith.constant dense<0.000000e+00> : vector<8x128xf32>
    %10 = tpu.matmul %8, %9, %cst_7 {dimension_numbers = #tpu.dot_dimension_numbers<[1], [0], [0], [1], [0, 0, 1, 1], [], []>} : vector<8x128xf32>, vector<128x128xf32>, vector<8x128xf32> -> vector<8x128xf32>
    %c0_8 = arith.constant 0 : index
    %c0_9 = arith.constant 0 : index
    %11 = vector.load %arg5[%c0_8, %c0_9] : memref<1x128xf32, #tpu.memory_space<vmem>>, vector<1x128xf32>
    %12 = vector.broadcast %11 : vector<1x128xf32> to vector<8x128xf32>
    %13 = arith.addf %10, %12 : vector<8x128xf32>
    %14 = arith.negf %13 : vector<8x128xf32>
    %15 = math.exp %14 : vector<8x128xf32>
    %cst_10 = arith.constant 1.000000e+00 : f32
    %16 = vector.broadcast %cst_10 : f32 to vector<8x128xf32>
    %17 = arith.addf %16, %15 : vector<8x128xf32>
    %18 = arith.divf %16, %17 : vector<8x128xf32>
    %19 = arith.subf %6, %7 : vector<8x128xf32>
    %20 = arith.mulf %18, %19 : vector<8x128xf32>
    %21 = arith.addf %7, %20 : vector<8x128xf32>
    %22 = vector.extract_strided_slice %21 {offsets = [0, 0], sizes = [8, 32], strides = [1, 1]} : vector<8x128xf32> to vector<8x32xf32>
    %c0_11 = arith.constant 0 : index
    %c0_12 = arith.constant 0 : index
    %23 = vector.load %arg6[%c0_11, %c0_12] : memref<8x32xf32, #tpu.memory_space<vmem>>, vector<8x32xf32>
    tpu.vector_store %arg6[%c0_11, %c0_12], %22 {strides = array<i32>} : memref<8x32xf32, #tpu.memory_space<vmem>>, vector<8x32xf32>,
    return
  }
  func.func @transform_0(%arg0: i32) -> (i32, i32) {
    %c0_i32 = arith.constant 0 : i32
    %c0_i32_0 = arith.constant 0 : i32
    return %arg0, %c0_i32 : i32, i32
  }
  func.func @transform_1(%arg0: i32) -> (i32, i32) {
    %c0_i32 = arith.constant 0 : i32
    %c0_i32_0 = arith.constant 0 : i32
    %c0_i32_1 = arith.constant 0 : i32
    return %c0_i32, %c0_i32_0 : i32, i32
  }
  func.func @transform_2(%arg0: i32) -> (i32, i32) {
    %c0_i32 = arith.constant 0 : i32
    %c0_i32_0 = arith.constant 0 : i32
    %c0_i32_1 = arith.constant 0 : i32
    return %c0_i32, %c0_i32_0 : i32, i32
  }
  func.func @transform_3(%arg0: i32) -> (i32, i32) {
    %c0_i32 = arith.constant 0 : i32
    %c0_i32_0 = arith.constant 0 : i32
    %c0_i32_1 = arith.constant 0 : i32
    return %c0_i32, %c0_i32_0 : i32, i32
  }
  func.func @transform_4(%arg0: i32) -> (i32, i32) {
    %c0_i32 = arith.constant 0 : i32
    %c0_i32_0 = arith.constant 0 : i32
    %c0_i32_1 = arith.constant 0 : i32
    return %c0_i32, %c0_i32_0 : i32, i32
  }
  func.func @transform_5(%arg0: i32) -> (i32, i32) {
    %c0_i32 = arith.constant 0 : i32
    %c0_i32_0 = arith.constant 0 : i32
    return %arg0, %c0_i32 : i32, i32
  }
}

</mosaic_0001>

<bundles_post_ra>
// kernel: _dpp_forward.1
= control target key start
LH: loop header
LB: loop body
LE: loop exit
PB: predicated region body
PF: predicated region fallthrough
CT: control target
= control target key end

     0   :  { %10 = vsyncpa [#allocation3], 0  ;;  %s1310_s0 = inlined_call_operand.hbm [shape: f32[16,32], index: 0, kind: input, shape index: {}]   ;;  %s1311_s1 = inlined_call_operand.hbm [shape: f32[32,384], index: 1, kind: input, shape index: {}]   ;;  %s1312_s2 = inlined_call_operand.vmem [shape: f32[1,384], index: 2, kind: input, shape index: {}]   ;;  %s1313_s3 = inlined_call_operand.hbm [shape: f32[128,128], index: 3, kind: input, shape index: {}]   ;;  %s1314_s4 = inlined_call_operand.vmem [shape: f32[1,128], index: 4, kind: input, shape index: {}]   ;;  %s1315_s5 = inlined_call_operand.hbm [shape: f32[16,32], index: 5, kind: output, shape index: {}]  }
   0x1   :  { %12 = vsyncpa [#allocation3 + $0x1], 0 }
   0x2   :  { %13 = vsyncpa [#allocation6], 0 }
   0x3   :  { %14 = vsyncpa [#allocation4], 0 }
   0x4   :  { %16 = vsyncpa [#allocation4 + $0x1], 0  ;;  %s1053_s18 = smov 0   ;;  %s1055_s19 = smov 0  }
   0x5   :  { %s1057_s20 = smov 0   ;;  %s1059_s21 = smov 0  }
   0x6 LB: > { %s1074_s22 = sadd.s32 4294967295, %s1010_s21   ;;  %s650_s23 = sadd.s32 4294967294, %s1010_s21   ;;  %s1010_s21 = sphi %s1059_s21, %s1335_s21   ;;  %s1006_s20 = sphi %s1057_s20, %s1334_s20   ;;  %s1002_s19 = sphi %s1055_s19, %s1333_s19   ;;  %s998_s18 = sphi %s1053_s18, %s1332_s18  }
   0x7   : > { %p42_p0 = scmp.ne.s32.totalorder %s1002_s19, %s998_s18  ;;  %p1316_p1 = scmp.eq.s32.totalorder %s1074_s22, 0 }
   0x8   : > { %p156_p3 = scmp.eq.s32.totalorder %s650_s23, 1  ;;  %p651_p5 = scmp.ge.s32.totalorder %s1010_s21, 1 }
   0x9   : > { %p1083_p4 = por %p1316_p1, %p42_p0  ;;  %p163_p7 = scmp.lt.s32.totalorder %s1010_s21, 3 }
   0xa   : > { %p1088_p6 = por %p156_p3, %p42_p0  ;;  %s1012_s27 = smov [#allocation5]  }
   0xb   : > { %s1319_s24 = scalar_select %p1083_p4, 1, 0 }
   0xc   : > { %s1320_s25 = scalar_select %p1088_p6, 1, 0 }
   0xd   : > { %p1093_p8 = pnand %p651_p5, %p163_p7  ;;  %s175_s28 = sshll.u32 %s1012_s27, 4  ;;  %s1097_s28 = int_to_ptr.vmem [resolvable:$true] %s175_s28 }
   0xe   : > { %s1013_s30 = smov [#allocation7]   ;;  %s854_s9 = scalar_lea.hbm %s1311_s1, 1536 }
   0xf   : > { %p788_p9 = pneg %p1093_p8  ;;  %s191_s6 = sshll.u32 %s1013_s30, 4  ;;  %s1108_s6 = int_to_ptr.vmem [resolvable:$true] %s191_s6 }
  0x10   : > { %p855_p12 = scmp.ne.s32.totalorder %s1311_s1, %s854_s9  ;;  %p861_p5 = scmp.lt.u32.totalorder %s854_s9, %s1311_s1 }
  0x11   : > { %p1104_p11 = pnand %p788_p9, %p1316_p1 }
  0x13   : > { %p856_p13 = pneg %p1104_p11 }
  0x15   : > { %p857_p0 = pnand %p856_p13, %p855_p12 }
  0x17   : > { %p858_p3 = pneg %p857_p0 }
  0x19   : > { %p863_p7 = pnand %p861_p5, %p858_p3 }
  0x1b   : > { %866 = shalt.err (!%p863_p7)
}
  0x1c   : > { %s867_s14 = scalar_lea.vmem %s1097_s28, 1536  ;;  %p875_p2 = scmp.lt.s32.totalorder %s1097_s28, %s1097_s28 }
  0x1d   : > { %p868_p9 = scmp.ne.s32.totalorder %s1097_s28, %s867_s14  ;;  %p876_p12 = scmp.lt.s32.totalorder %s867_s14, %s867_s14 }
  0x1f   : > { %p870_p10 = pnand %p868_p9, %p856_p13  ;;  %p877_p0 = por %p876_p12, %p875_p2 }
  0x21   : > { %p871_p1 = pneg %p870_p10 }
  0x23   : > { %p878_p6 = pnand %p877_p0, %p871_p1 }
  0x25   : > { %881 = shalt.err (!%p878_p6)
}
  0x26   : > { %s1014_s15 = smov 384   ;;  %s1015_s16 = smov 24  }
  0x27   : > { %791 = dma.hbm_to_vmem [thread:$0]  (!%p1104_p11), %s1311_s1, 1536, %s1097_s28, [#allocation6], %s1014_s15, %s1014_s15, %s1015_s16  }
  0x28   : > { %s882_s7 = scalar_lea.hbm %s1313_s3, 2048 }
  0x29   : > { %p883_p2 = scmp.ne.s32.totalorder %s1313_s3, %s882_s7  ;;  %p889_p10 = scmp.lt.u32.totalorder %s882_s7, %s1313_s3 }
  0x2b   : > { %p885_p1 = pnand %p883_p2, %p856_p13 }
  0x2d   : > { %p886_p6 = pneg %p885_p1 }
  0x2f   : > { %p891_p3 = pnand %p889_p10, %p886_p6 }
  0x31   : > { %894 = shalt.err (!%p891_p3)
}
  0x32   : > { %s895_s28 = scalar_lea.vmem %s1108_s6, 2048  ;;  %p903_p12 = scmp.lt.s32.totalorder %s1108_s6, %s1108_s6 }
  0x33   : > { %p896_p5 = scmp.ne.s32.totalorder %s1108_s6, %s895_s28  ;;  %p904_p0 = scmp.lt.s32.totalorder %s895_s28, %s895_s28 }
  0x35   : > { %p898_p7 = pnand %p896_p5, %p856_p13  ;;  %p905_p2 = por %p904_p0, %p903_p12 }
  0x37   : > { %p899_p9 = pneg %p898_p7 }
  0x39   : > { %p906_p1 = pnand %p905_p2, %p899_p9 }
  0x3b   : > { %909 = shalt.err (!%p906_p1)
}
  0x3c   : > { %s1016_s12 = smov 128   ;;  %s1017_s13 = smov 8  }
  0x3d   : > { %794 = dma.hbm_to_vmem [thread:$0]  (!%p1104_p11), %s1313_s3, 2048, %s1108_s6, [#allocation6], %s1016_s12, %s1016_s12, %s1017_s13  }
  0x3e   : > { %s1163_s16 = sadd.s32 1, %s1010_s21   ;;  %s29_s23 = sadd.s32 1, %s1006_s20 }
  0x3f   : > { %s26_s17 = ssub.s32 %s1010_s21, %s1163_s16  ;;  %p36_p6 = scmp.ne.s32.totalorder %s1006_s20, %s1002_s19 }
  0x40   : > { %p27_p13 = scmp.eq.s32.totalorder %s26_s17, 0  ;;  %p37_p10 = scmp.eq.s32.totalorder %s1010_s21, 0 }
  0x41   : > { %p1323_p5 = scmp.eq.s32.totalorder %s1074_s22, 1  ;;  %p805_p9 = scmp.lt.s32.totalorder %s1010_s21, 2 }
  0x42   : > { %s1172_s27 = scalar_select %p27_p13, %s1006_s20, %s29_s23  }
  0x43   : > { %p38_p3 = por %p37_p10, %p36_p6  ;;  %p1176_p7 = por %p1323_p5, %p36_p6 }
  0x44   : > { %s208_s29 = sand.u32 1, %s1006_s20   ;;  %s656_s6 = sshll.u32 %s1010_s21, 7 }
  0x45   : > { %s1324_s30 = scalar_select %p1176_p7, 1, 0 }
  0x46   : > { %s655_s7 = sshll.u32 %s208_s29, 3  ;;  %s1186_s10 = scalar_lea.hbm %s1310_s0, %s656_s6 }
  0x47   : > { %s212_s11 = scalar_lea.vmem [#allocation2], %s655_s7  ;;  %p1190_p11 = pnand %p805_p9, %p38_p3 }
  0x48   : > { %s219_s28 = sshll.u32 %s212_s11, 4  ;;  %s209_s13 = scalar_lea.sflag [#allocation3], %s208_s29  ;;  %s1188_s28 = int_to_ptr.vmem [resolvable:$true] %s219_s28 }
  0x49   : > { %s910_s14 = scalar_lea.hbm %s1186_s10, 128  ;;  %p912_p0 = pneg %p1190_p11 }
  0x4a   : > { %p911_p12 = scmp.ne.s32.totalorder %s1186_s10, %s910_s14  ;;  %s915_s23 = scalar_lea.hbm %s1310_s0, 256 }
  0x4b   : > { %p916_p13 = scmp.lt.u32.totalorder %s1186_s10, %s1310_s0  ;;  %p917_p6 = scmp.lt.u32.totalorder %s915_s23, %s910_s14 }
  0x4c   : > { %p913_p2 = pnand %p912_p0, %p911_p12  ;;  %p919_p3 = scmp.lt.u32.totalorder %s910_s14, %s1186_s10 }
  0x4d   : > { %p918_p10 = por %p917_p6, %p916_p13 }
  0x4e   : > { %p914_p1 = pneg %p913_p2 }
  0x4f   : > { %p920_p5 = por %p919_p3, %p918_p10 }
  0x51   : > { %p921_p9 = pnand %p920_p5, %p914_p1 }
  0x53   : > { %924 = shalt.err (!%p921_p9)
}
  0x54   : > { %s925_s29 = scalar_lea.vmem %s1188_s28, 128  ;;  %s1018_s8 = smov [#allocation2]  }
  0x55   : > { %p926_p12 = scmp.ne.s32.totalorder %s1188_s28, %s925_s29  ;;  %s930_s9 = sshll.u32 %s1018_s8, 4  ;;  %s931_s9 = int_to_ptr.vmem [resolvable:$false] %s930_s9 }
  0x56   : > { %s932_s11 = scalar_lea.vmem %s931_s9, 256  ;;  %p933_p4 = scmp.lt.s32.totalorder %s1188_s28, %s931_s9 }
  0x57   : > { %p928_p2 = pnand %p926_p12, %p912_p0  ;;  %p934_p13 = scmp.lt.s32.totalorder %s932_s11, %s925_s29 }
  0x59   : > { %p929_p7 = pneg %p928_p2  ;;  %p935_p6 = por %p934_p13, %p933_p4 }
  0x5b   : > { %p936_p10 = pnand %p935_p6, %p929_p7 }
  0x5d   : > { %939 = shalt.err (!%p936_p10)
}
  0x5e   : > { %798 = dma.hbm_to_vmem [thread:$0]  (!%p1190_p11), %s1186_s10, 128, %s1188_s28, %s209_s13  }
  0x5f   : > { %228 = sbr.rel (%p1093_p8) target bundleno = 597 (0x255), region = 40  ;;  %s1222_s14 = sand.u32 (!%p1093_p8), 1, %s1002_s19  }
  0x60   : > { %s658_s15 = sshll.u32 (!%p1093_p8), %s1222_s14, 3  ;;  %s231_s17 = scalar_lea.sflag (!%p1093_p8), [#allocation3], %s1222_s14 }
  0x61   : > { %s1228_s23 = scalar_lea.vmem (!%p1093_p8), [#allocation2], %s658_s15  ;;  %p1326_p4 = scmp.ne.s32.totalorder (!%p1093_p8), %s1319_s24, 0 }
  0x66   : > { %985 = dma.done.wait (%p1326_p4), %s231_s17, 128  }
  0x67   : > { %987 = vsyncadd (%p1326_p4), %s231_s17, 4294967168  ;;  %p1327_p7 = scmp.eq.s32.totalorder %s1074_s22, 0 }
  0x69   : > { %989 = dma.done.wait (%p1327_p7), [#allocation6], 3584   ;;  %p1328_p8 = pmov %p1327_p7 }
  0x6a   : > { %v1019_v0 = vmov 0.0   ;;  %v1020_v1 = vmov 0.0|0.0   ;;  %vm1021_vm0 = vmmov 0   ;;  %v271_v2 = vld [vmem:[#allocation5 + $0x8] sm:$0xff]  ;;  %v274_v3 = vld [vmem:[#allocation5 + $0x20] sm:$0xff]  ;;  %v273_v6 = vld [vmem:[#allocation5 + $0x18] sm:$0xff]  ;;  %v284_v45 = vlaneseq }
  0x6b   : > { %991 = vsyncadd (%p1328_p8), [#allocation6], 4294963712  ;;  %367 = vmatprep.mubr.f32.mxu1 %v1019_v0  ;;  %752 = vmatprep.subr.bf16.mxu0 %v1020_v1  ;;  %v270_v4 = vld [vmem:[#allocation5] sm:$0xff]  ;;  %v738_v5 = vpack.c.bf16 %v274_v3, %v271_v2  ;;  %v277_v7 = vld [vmem:[#allocation5 + $0x38] sm:$0xff]  ;;  %vm299_vm1 = vcmask 261120   ;;  %s667_s12 = sshll.u32 %s1074_s22, 7 }
  0x6c   : > { %735 = vmatprep.mubr.msk.f32.mxu0 %vm1021_vm0, %v1019_v0  ;;  %v280_v8 = vld [vmem:[#allocation5 + $0x50] sm:$0xff]  ;;  %v740_v9 = vpack.c.bf16 %v273_v6, %v270_v4  ;;  %v279_v12 = vld [vmem:[#allocation5 + $0x48] sm:$0xff]  ;;  %v444_v15 = vld [vmem:[#allocation7] sm:$0xff]  ;;  %v285_v46 = vshrl.u32 %v284_v45, 7  ;;  %s268_s13 = scalar_lea.vmem [#allocation8], %s658_s15  ;;  %s1265_s8 = scalar_lea.hbm %s1315_s5, %s667_s12 }
  0x6d   : > { %v742_v10 = vpack.c.bf16 %v280_v8, %v277_v7  ;;  %v276_v11 = vld [vmem:[#allocation5 + $0x30] sm:$0xff]  ;;  %739 = vmatprep.subr.bf16.mxu1 %v738_v5  ;;  %v445_v16 = vld [vmem:[#allocation7 + $0x8] sm:$0xff]  ;;  %v447_v20 = vld [vmem:[#allocation7 + $0x18] sm:$0xff]  ;;  %s561_s7 = sshll.u32 %s268_s13, 4  ;;  %s548_s9 = scalar_lea.sflag [#allocation4], %s1222_s14  ;;  %s1267_s7 = int_to_ptr.vmem [resolvable:$true] %s561_s7 }
  0x6e   : > { %741 = vmatpush1.bf16.msra.mxu1 %v740_v9  ;;  %v744_v13 = vpack.c.bf16 %v279_v12, %v276_v11  ;;  %v272_v14 = vld [vmem:[#allocation5 + $0x10] sm:$0xff]  ;;  %v275_v17 = vld [vmem:[#allocation5 + $0x28] sm:$0xff]  ;;  %v753_v18 = vpack.c.bf16 %v445_v16, %v444_v15  ;;  %v448_v24 = vld [vmem:[#allocation7 + $0x20] sm:$0xff]  ;;  %v286_v47 = vsub.s32 0, %v285_v46  ;;  %v290_v49 = vsub.s32 1, %v285_v46  ;;  %s940_s11 = scalar_lea.vmem %s1267_s7, 128 }
  0x6f   : > { %743 = vmatprep.subr.bf16.mxu1 %v742_v10  ;;  %v446_v19 = vld [vmem:[#allocation7 + $0x10] sm:$0xff]  ;;  %v747_v23 = vpack.c.bf16 %v275_v17, %v272_v14  ;;  %v449_v25 = vld [vmem:[#allocation7 + $0x28] sm:$0xff]  ;;  %v278_v26 = vld [vmem:[#allocation5 + $0x40] sm:$0xff]  ;;  %v294_v55 = vsub.s32 2, %v285_v46  ;;  %p941_p11 = scmp.ne.s32.totalorder %s1267_s7, %s940_s11  ;;  %p1329_p0 = scmp.ne.s32.totalorder %s1324_s30, 0 }
  0x70   : > { %754 = vmatpush3.bf16.msra.mxu0 %v753_v18  ;;  %v756_v21 = vpack.c.bf16 %v447_v20, %v446_v19  ;;  %v269_v22 = vld [vmem:[%s1228_s23] sm:$0xff]  ;;  %v759_v28 = vpack.c.bf16 %v449_v25, %v448_v24  ;;  %v452_v33 = vld [vmem:[#allocation7 + $0x40] sm:$0xff]  ;;  %v453_v34 = vld [vmem:[#allocation7 + $0x48] sm:$0xff]  ;;  %s1022_s22 = smov [#allocation8]  }
  0x71   : > { %755 = vmatprep.subr.bf16.mxu0 %v1020_v1  ;;  %v281_v27 = vld [vmem:[#allocation5 + $0x58] sm:$0xff]  ;;  %v450_v30 = vld [vmem:[#allocation7 + $0x30] sm:$0xff]  ;;  %v765_v35 = vpack.c.bf16 %v453_v34, %v452_v33  ;;  %v456_v39 = vld [vmem:[#allocation7 + $0x60] sm:$0xff]  ;;  %p942_p1 = pnand %p941_p11, %p1329_p0  ;;  %s944_s15 = sshll.u32 %s1022_s22, 4  ;;  %s945_s15 = int_to_ptr.vmem [resolvable:$false] %s944_s15 }
  0x72   : > { %745 = vmatpush1.bf16.msra.mxu1 %v744_v13  ;;  %v750_v29 = vpack.c.bf16 %v281_v27, %v278_v26  ;;  %v451_v31 = vld [vmem:[#allocation7 + $0x38] sm:$0xff]  ;;  %v454_v36 = vld [vmem:[#allocation7 + $0x50] sm:$0xff]  ;;  %v457_v40 = vld [vmem:[#allocation7 + $0x68] sm:$0xff]  ;;  %s946_s17 = scalar_lea.vmem %s945_s15, 256  ;;  %p947_p5 = scmp.lt.s32.totalorder %s1267_s7, %s945_s15 }
  0x73   : > { %746 = vmatprep.subr.bf16.mxu1 %v1020_v1  ;;  %v762_v32 = vpack.c.bf16 %v451_v31, %v450_v30  ;;  %v455_v37 = vld [vmem:[#allocation7 + $0x58] sm:$0xff]  ;;  %v771_v41 = vpack.c.bf16 %v457_v40, %v456_v39  ;;  %v458_v42 = vld [vmem:[#allocation7 + $0x70] sm:$0xff]  ;;  %p943_p3 = pneg %p942_p1  ;;  %p948_p9 = scmp.lt.s32.totalorder %s946_s17, %s940_s11 }
  0x74   : > { %757 = vmatpush3.bf16.msra.mxu0 %v756_v21  ;;  %v768_v38 = vpack.c.bf16 %v455_v37, %v454_v36  ;;  %v459_v43 = vld [vmem:[#allocation7 + $0x78] sm:$0xff]  ;;  %v282_v48 = vld [vmem:[%s1312_s2] sm:$0x7] }
  0x75   : > { %662 = vmatmul.mubr.msk.f32.vlgmr.msra.gmra.mrb[0].mxu1 %vm299_vm1, %v269_v22  ;;  %758 = vmatprep.subr.bf16.mxu0 %v1020_v1  ;;  %v774_v44 = vpack.c.bf16 %v459_v43, %v458_v42  ;;  %v287_v50 = vrot.slane %v282_v48, %v286_v47  ;;  %v291_v51 = vrot.slane %v282_v48, %v290_v49  ;;  %v664_v62 = vld [vmem:[%s1314_s4] ss:$0 sm:$0xff]  ;;  %p949_p12 = por %p948_p9, %p947_p5 }
  0x76   : > { %748 = vmatpush3.bf16.msra.mxu1 %v747_v23  ;;  %700 = vmatprep.mubr.msk.f32.mxu1 %vm1021_vm0, %v1019_v0  ;;  %v295_v58 = vrot.slane %v282_v48, %v294_v55 }
  0x77   : > { %749 = vmatprep.subr.bf16.mxu1 %v1020_v1  ;;  %p950_p2 = pnand %p949_p12, %p943_p3 }
  0x78   : > { %760 = vmatpush3.bf16.msra.mxu0 %v759_v28 }
  0x79   : > { %761 = vmatprep.subr.bf16.mxu0 %v1020_v1 }
  0x7a   : > { %751 = vmatpush3.bf16.msra.mxu1 %v750_v29 }
  0x7c   : > { %763 = vmatpush3.bf16.msra.mxu0 %v762_v32 }
  0x7d   : > { %701 = vmatmul.mubr.msk.f32.vlgmr.msra.gmra.mrb[2].mxu1 %vm299_vm1, %v269_v22  ;;  %764 = vmatprep.subr.bf16.mxu0 %v1020_v1 }
  0x80   : > { %766 = vmatpush3.bf16.msra.mxu0 %v765_v35 }
  0x81   : > { %767 = vmatprep.subr.bf16.mxu0 %v1020_v1 }
  0x84   : > { %769 = vmatpush3.bf16.msra.mxu0 %v768_v38 }
  0x85   : > { %770 = vmatprep.subr.bf16.mxu0 %v1020_v1 }
  0x88   : > { %772 = vmatpush3.bf16.msra.mxu0 %v771_v41 }
  0x89   : > { %773 = vmatprep.subr.bf16.mxu0 %v1020_v1 }
  0x8c   : > { %775 = vmatpush3.bf16.msra.mxu0 %v774_v44 }
 0x148   : > { %v369_v52 = vpop.f32.mrb[0].mxu1 }
 0x149   : > { %v370_v53 = vadd.f32 %v369_v52, %v287_v50  ;;  %v371_v54 = vpop.f32.mrb[1].mxu1 }
 0x14a   : > { %v372_v56 = vadd.f32 %v371_v54, %v291_v51 }
 0x14c   : > { %v543_v57 = vsub.f32 %v370_v53, %v372_v56 }
 0x150   : > { %v440_v59 = vpop.f32.mrb[2].mxu1 }
 0x151   : > { %v441_v60 = vadd.f32 %v440_v59, %v295_v58  ;;  %v702_v61 = vpop.f32.mrb[3].mxu1 }
 0x153   : > { %736 = vmatmul.mubr.f32.vlgmr.msra.gmra.mrb[0].mxu0 %v441_v60 }
 0x226   : > { %v533_v63 = vpop.f32.mrb[0].mxu0 }
 0x227   : > { %v534_v0 = vadd.f32 %v664_v62, %v533_v63  ;;  %v737_v1 = vpop.f32.mrb[1].mxu0 }
 0x229   : > { %v665_v2 = vmul.f32 -1.442695, %v534_v0 }
 0x22b   : > { %850 = vpow2.f32 %v665_v2 }
 0x235   : > { %v851_v3 = vpop.eup %850 }
 0x236   : > { %v540_v4 = vadd.f32 1.0, %v851_v3 }
 0x238   : > { %852 = vrcp.f32 %v540_v4 }
 0x242   : > { %v853_v5 = vpop.eup %852 }
 0x243   : > { %v544_v6 = vmul.f32 %v853_v5, %v543_v57 }
 0x245   : > { %v545_v7 = vadd.f32 %v544_v6, %v372_v56 }
 0x247   : > { %546 = vst.msk [vmem:[%s268_s13] sm:$0xff] %vm299_vm1, %v545_v7 }
 0x248   : > { %953 = shalt.err (!%p950_p2)
}
 0x249   : > { %s954_s14 = scalar_lea.hbm %s1265_s8, 128  ;;  %s958_s26 = scalar_lea.hbm %s1315_s5, 256 }
 0x24a   : > { %p955_p13 = scmp.ne.s32.totalorder %s1265_s8, %s954_s14  ;;  %p959_p4 = scmp.lt.u32.totalorder %s1265_s8, %s1315_s5 }
 0x24b   : > { %p960_p7 = scmp.lt.u32.totalorder %s958_s26, %s954_s14  ;;  %p962_p11 = scmp.lt.u32.totalorder %s954_s14, %s1265_s8 }
 0x24c   : > { %p956_p6 = pnand %p955_p13, %p1329_p0 }
 0x24d   : > { %p961_p8 = por %p960_p7, %p959_p4 }
 0x24e   : > { %p957_p10 = pneg %p956_p6 }
 0x24f   : > { %p963_p1 = por %p962_p11, %p961_p8 }
 0x251   : > { %p964_p3 = pnand %p963_p1, %p957_p10 }
 0x253   : > { %967 = shalt.err (!%p964_p3)
}
 0x254   : > { %786 = dma.vmem_to_hbm [thread:$0]  (%p1329_p0), %s1267_s7, 128, %s1265_s8, %s548_s9  }
 0x255 PF: > { %s573_s12 = sand.u32 1, %s998_s18   ;;  %p1330_p5 = scmp.ne.s32.totalorder %s1320_s25, 0 }
 0x256   : > { %p1331_p9 = scmp.ge.s32.totalorder %s1010_s21, 2  ;;  %s574_s13 = scalar_lea.sflag [#allocation4], %s573_s12 }
 0x258   : > { %p800_p12 = pnand %p1331_p9, %p1330_p5 }
 0x25a   : > { %993 = dma.done.wait (!%p800_p12), %s574_s13, 128  }
 0x25b   : > { %995 = vsyncadd (!%p800_p12), %s574_s13, 4294967168  ;;  %p19_p2 = scmp.ge.s32.totalorder %s1163_s16, 4   ;;  %s1332_s18 = smov %s1002_s19 }
 0x25c   : > { %s1333_s19 = smov %s1006_s20  ;;  %s1334_s20 = smov %s1172_s27 }
 0x25d   : > { %s1335_s21 = smov %s1163_s16  ;;  %21 = sbr.rel (!%p19_p2) target bundleno = 6 (0x6), region = 93 }
 0x264   :  { %579 = vsyncpa [#allocation3], 1 }
 0x265   :  { %581 = vsyncpa [#allocation3 + $0x1], 1 }
 0x266   :  { %582 = vsyncpa [#allocation6], 1 }
 0x267   :  { %583 = vsyncpa [#allocation4], 1 }
 0x268   :  { %585 = vsyncpa [#allocation4 + $0x1], 1 }

</bundles_post_ra>
